<compile_context>
chip_gen: v5e
topology: v5e:2x2
jax: 0.10.0
libtpu: 0.0.40
codegen_flags: <defaults>
</compile_context>

<pallas_src>
import functools

import jax
import jax.numpy as jnp
from jax.experimental import pallas as pl
from jax.experimental.pallas import tpu as pltpu

BN_EPS = 1e-5
SIN_KER_SIZE = [1, 1, 3, 3]
K_MAX = max(SIN_KER_SIZE)


def _round_up(x, m):
    return ((x + m - 1) // m) * m


def _conv_bn_relu_kernel(lout_ref, ks_ref, x_ref, w_ref, gb_ref, o_ref,
                         acc_ref, sum_ref, sq_ref, *,
                         batch, tile_l, seq_len, o_pad, compute_dtype):
    """One grid step == one (branch, phase, L-tile).

    grid = (n_branch, 2, n_l_tiles).  Phase 0 accumulates the per-branch BN
    statistics across L tiles; phase 1 re-runs the conv matmul for the tile and
    applies the fused BatchNorm(train) + ReLU.

    lout_ref: SMEM (n_branch,) int32           valid output length per branch
    ks_ref:   SMEM (n_branch,) int32           conv kernel size per branch
    x_ref:    VMEM (1, B, TL + K_MAX - 1, E)   overlapping (halo) input window
    w_ref:    VMEM (1, K_MAX, E, O_pad)        tap-major conv weight (zero taps for k=1)
    gb_ref:   VMEM (1, 2, O_pad)               [gamma, beta] (zero in the O padding)
    o_ref:    VMEM (1, B, TL, O_pad)           output tile (written in phase 1 only)
    acc_ref:  VMEM (B, TL, O_pad) f32          conv accumulator (rebuilt every step)
    sum_ref:  VMEM (1, O_pad) f32              running sum   (per branch)
    sq_ref:   VMEM (1, O_pad) f32              running sumsq (per branch)
    """
    br = pl.program_id(0)
    ph = pl.program_id(1)
    lt = pl.program_id(2)

    l_out = lout_ref[br]                 # valid output length for this branch
    ksize = ks_ref[br]                   # conv kernel size (1 or 3)
    tile_start = lt * tile_l

    # ---- Conv1d: per-tap MXU matmuls; taps beyond this branch's k are skipped
    x0 = x_ref[0, :, 0:tile_l, :].astype(compute_dtype)
    w0 = w_ref[0, 0].astype(compute_dtype)
    acc_ref[...] = jnp.einsum("ble,eo->blo", x0, w0,
                              preferred_element_type=jnp.float32)
    for j in range(1, K_MAX):
        @pl.when(j < ksize)
        def _(j=j):
            xj = x_ref[0, :, j:j + tile_l, :].astype(compute_dtype)
            wj = w_ref[0, j].astype(compute_dtype)
            acc_ref[...] += jnp.einsum("ble,eo->blo", xj, wj,
                                       preferred_element_type=jnp.float32)

    # ---- Phase 0: accumulate biased BatchNorm statistics over valid rows ----
    @pl.when(jnp.logical_and(ph == 0, lt == 0))
    def _init_stats():
        sum_ref[...] = jnp.zeros_like(sum_ref)
        sq_ref[...] = jnp.zeros_like(sq_ref)

    @pl.when(ph == 0)
    def _phase0():
        acc = acc_ref[...]
        # Rows >= seq_len are exact zeros (zero-padded x, no conv bias), so the
        # only rows that need masking are [l_out, seq_len): at most K_MAX - 1
        # rows in a single boundary tile of the k=3 branches.
        needs_mask = jnp.logical_and(
            l_out < seq_len,
            jnp.logical_and(l_out < tile_start + tile_l, tile_start < seq_len))

        @pl.when(jnp.logical_not(needs_mask))
        def _plain():
            sum_ref[...] += jnp.sum(acc, axis=(0, 1),
                                    keepdims=True).reshape(1, o_pad)
            sq_ref[...] += jnp.sum(acc * acc, axis=(0, 1),
                                   keepdims=True).reshape(1, o_pad)

        @pl.when(needs_mask)
        def _masked():
            pos = jax.lax.broadcasted_iota(jnp.int32, (1, tile_l, 1), 1)
            maskf = (pos < (l_out - tile_start)).astype(jnp.float32)
            acc_m = acc * maskf
            sum_ref[...] += jnp.sum(acc_m, axis=(0, 1),
                                    keepdims=True).reshape(1, o_pad)
            sq_ref[...] += jnp.sum(acc_m * acc, axis=(0, 1),
                                   keepdims=True).reshape(1, o_pad)

    # ---- Phase 1: fused BN affine + ReLU, lane-dense store ------------------
    @pl.when(ph == 1)
    def _phase1():
        inv_n = 1.0 / (jnp.float32(batch) * l_out.astype(jnp.float32))
        mean = (sum_ref[...] * inv_n).reshape(1, 1, o_pad)
        ex2 = (sq_ref[...] * inv_n).reshape(1, 1, o_pad)
        # TODO(synk): single-pass E[x^2]-E[x]^2 in f32 can cancel when
        # |mean| >> std; a Chan/Welford-style merged variance would be more
        # robust if that ever matters for this workload.
        var = jnp.maximum(ex2 - mean * mean, 0.0)
        gamma = gb_ref[0, 0:1, :].reshape(1, 1, o_pad)
        beta = gb_ref[0, 1:2, :].reshape(1, 1, o_pad)
        scale = gamma * jax.lax.rsqrt(var + BN_EPS)        # rsqrt -> EUP slot
        shift = beta - mean * scale
        y = jnp.maximum(acc_ref[...] * scale + shift, 0.0)
        # Rows >= l_out (and O padding lanes) are unspecified here; the wrapper
        # slices them off before returning.
        o_ref[0] = y.astype(o_ref.dtype)


def init_params(key, in_channels, out_channels):
    """Stacked deterministic parameters for the 4 single-conv branches.

    Returns:
      w:  (4, K_MAX, in_channels, out_channels) tap-major conv weights,
          zero-padded along the tap axis for k=1 branches.
      gb: (4, 2, out_channels)                  [gamma, beta] per branch.
    The Conv1d bias is omitted: under training-mode BatchNorm a per-channel
    additive bias cancels exactly in the mean subtraction (variance unchanged).
    """
    ws, gbs = [], []
    for i, k in enumerate(SIN_KER_SIZE):
        kw, kg, kb = jax.random.split(jax.random.fold_in(key, i), 3)
        w = 0.1 * jax.random.normal(kw, (k, in_channels, out_channels), jnp.float32)
        w = jnp.pad(w, ((0, K_MAX - k), (0, 0), (0, 0)))
        gamma = 1.0 + 0.1 * jax.random.normal(kg, (out_channels,), jnp.float32)
        beta = 0.1 * jax.random.normal(kb, (out_channels,), jnp.float32)
        ws.append(w)
        gbs.append(jnp.stack([gamma, beta], axis=0))
    return {"w": jnp.stack(ws, axis=0), "gb": jnp.stack(gbs, axis=0)}


def text_double_cnn1d_forward(question, params, *, tile_l=256, ncl_layout=False,
                              compute_dtype=jnp.float32, out_dtype=None,
                              lane_multiple=128, branch_core_parallel=False):
    """question: (B, L, E) channels-last (equivalent to PyTorch's
    question.permute(0, 2, 1) feeding Conv1d).

    Returns the list x of 4 branch outputs.  Default layout is channels-last
    (B, L_out, O); pass ncl_layout=True for PyTorch's (B, O, L_out).

    compute_dtype=jnp.bfloat16 is valid on all TPU generations (v5e included,
    its MXU is native bf16); accumulation and BN math stay f32.  Set
    lane_multiple=256 on v6e/v7x to also fill the 256-wide MXU N dimension, and
    branch_core_parallel=True on v7x to pin the 4 branches 2-per-TensorCore.
    # TODO(synk): the reference forward has no `return` statement (and is even
    # nested inside __init__); we return the computed list `x`, the only value
    # its body produces.  BatchNorm running_mean/var buffers are not updated.
    """
    B, L, E = question.shape
    w = params["w"]
    gb = params["gb"]
    n_branch, k_max, _, O = w.shape
    assert k_max == K_MAX
    out_dtype = question.dtype if out_dtype is None else out_dtype

    # ---- layout / tiling choices --------------------------------------------
    o_pad = _round_up(O, lane_multiple)
    w_p = jnp.pad(w, ((0, 0), (0, 0), (0, 0), (0, o_pad - O)))
    gb_p = jnp.pad(gb, ((0, 0), (0, 0), (0, o_pad - O)))   # zero gamma/beta pad

    tl = min(_round_up(max(tile_l, 8), 8), _round_up(L, 8))   # L-tile, mult of 8
    l_pad = _round_up(L, tl)
    n_lt = l_pad // tl
    win = tl + K_MAX - 1

    # Overlapping (halo) windows so every branch reuses the same K_MAX-tap view;
    # ~1% HBM copy of x, built once by XLA in the wrapper.
    x_padded = jnp.pad(question, ((0, 0), (0, l_pad - L + K_MAX - 1), (0, 0)))
    x_win = jnp.stack([x_padded[:, t * tl:t * tl + win, :] for t in range(n_lt)],
                      axis=0)                                  # (n_lt, B, win, E)

    louts = jnp.asarray([L - k + 1 for k in SIN_KER_SIZE], dtype=jnp.int32)
    ksizes = jnp.asarray(SIN_KER_SIZE, dtype=jnp.int32)

    kernel = functools.partial(_conv_bn_relu_kernel, batch=B, tile_l=tl,
                               seq_len=L, o_pad=o_pad, compute_dtype=compute_dtype)

    # ---- compiler params: VMEM budget, megacore semantics, cost hint --------
    try:
        info = pltpu.get_tpu_info()
        vmem_cap = int(getattr(info, "vmem_capacity_bytes", 0)) or (64 << 20)
    except Exception:
        vmem_cap = 64 << 20
    vmem_limit = int(min((3 * vmem_cap) // 4, 100 << 20))   # ~48MiB v7x, ~96MiB v5e/v6e

    if branch_core_parallel:
        # v7x: guarantee the 4 branches split 2-per-TensorCore.
        dim_sem = (pltpu.CORE_PARALLEL, pltpu.ARBITRARY, pltpu.ARBITRARY)
    else:
        dim_sem = ("parallel", "arbitrary", "arbitrary")

    in_itemsize = jnp.dtype(question.dtype).itemsize
    out_itemsize = jnp.dtype(out_dtype).itemsize
    cost = pl.CostEstimate(
        flops=4 * B * l_pad * E * o_pad * sum(SIN_KER_SIZE),   # 2 phases x 2MKN/tap
        transcendentals=n_branch * n_lt * o_pad,
        bytes_accessed=int(2 * n_branch * x_win.size * in_itemsize
                           + n_branch * B * l_pad * o_pad * out_itemsize
                           + (w_p.size + gb_p.size) * 4),
    )

    # Output index trick: during phase 0 every step pins output block (br, 0),
    # so nothing is written back to HBM until phase 1 overwrites it with real
    # data -> each output block is DMA'd out exactly once.
    out = pl.pallas_call(
        kernel,
        out_shape=jax.ShapeDtypeStruct((n_branch, B, l_pad, o_pad), out_dtype),
        grid_spec=pltpu.PrefetchScalarGridSpec(
            num_scalar_prefetch=2,                 # louts, ksizes -> SMEM
            grid=(n_branch, 2, n_lt),              # (branch, phase, L tile)
            in_specs=[
                pl.BlockSpec((1, B, win, E), lambda br, ph, lt, lo, ks: (lt, 0, 0, 0)),
                # w / gb are constant per branch; on v7x they could additionally
                # be single-buffered with pipeline_mode=pl.Buffered(1) if VMEM-tight.
                pl.BlockSpec((1, K_MAX, E, o_pad), lambda br, ph, lt, lo, ks: (br, 0, 0, 0)),
                pl.BlockSpec((1, 2, o_pad), lambda br, ph, lt, lo, ks: (br, 0, 0)),
            ],
            out_specs=pl.BlockSpec((1, B, tl, o_pad),
                                   lambda br, ph, lt, lo, ks: (br, 0, lt * ph, 0)),
            scratch_shapes=[
                pltpu.VMEM((B, tl, o_pad), jnp.float32),   # conv accumulator
                pltpu.VMEM((1, o_pad), jnp.float32),       # running sum
                pltpu.VMEM((1, o_pad), jnp.float32),       # running sumsq
            ],
        ),
        compiler_params=pltpu.CompilerParams(
            dimension_semantics=dim_sem,
            vmem_limit_bytes=vmem_limit,
        ),
        cost_estimate=cost,
    )(louts, ksizes, x_win, w_p, gb_p)

    outs = []
    for i, k in enumerate(SIN_KER_SIZE):
        lo = L - k + 1
        y = out[i, :, :lo, :O]                      # drop L padding + O lane padding
        outs.append(jnp.transpose(y, (0, 2, 1)) if ncl_layout else y)
    return outs


def _reference_forward(question, params):
    """Pure-JAX reference (channels-last outputs) for correctness checks."""
    w_all, gb = params["w"], params["gb"]
    outs = []
    for i, k in enumerate(SIN_KER_SIZE):
        w = w_all[i, :k]
        lo = question.shape[1] - k + 1
        acc = sum(
            jnp.einsum("ble,eo->blo", question[:, j:j + lo, :], w[j],
                       preferred_element_type=jnp.float32)
            for j in range(k)
        )
        mean = acc.mean(axis=(0, 1), keepdims=True)
        var = ((acc - mean) ** 2).mean(axis=(0, 1), keepdims=True)
        y = (acc - mean) * jax.lax.rsqrt(var + BN_EPS)
        y = y * gb[i, 0][None, None, :] + gb[i, 1][None, None, :]
        outs.append(jnp.maximum(y, 0.0))
    return outs


if __name__ == "__main__":
    B, L = 2, 16          # batch, sequence length
    EMBEDDING_DIM = 8     # in_channels
    TITLE_DIM = 16        # out_channels

    key = jax.random.PRNGKey(0)
    k_in, k_par = jax.random.split(key)

    question = jax.random.normal(k_in, (B, L, EMBEDDING_DIM), jnp.float32)
    params = init_params(k_par, EMBEDDING_DIM, TITLE_DIM)
    refs = _reference_forward(question, params)

    # 1) single-tile path
    outs = jax.block_until_ready(text_double_cnn1d_forward(question, params))
    for o, r, k in zip(outs, refs, SIN_KER_SIZE):
        assert o.shape == (B, L - k + 1, TITLE_DIM), o.shape
        assert bool(jnp.all(o >= 0.0))                      # ReLU output
        assert bool(jnp.allclose(o, r, rtol=1e-4, atol=1e-4)), (
            float(jnp.max(jnp.abs(o - r))))

    # 2) multi-tile path: exercises two-phase BN stats + boundary-tile masking
    outs_mt = jax.block_until_ready(
        text_double_cnn1d_forward(question, params, tile_l=8))
    for o, r in zip(outs_mt, refs):
        assert bool(jnp.allclose(o, r, rtol=1e-4, atol=1e-4)), (
            float(jnp.max(jnp.abs(o - r))))

    # 3) ragged length (L not a multiple of the tile) + grid padding
    question2 = jax.random.normal(jax.random.fold_in(k_in, 1),
                                  (B, 19, EMBEDDING_DIM), jnp.float32)
    refs2 = _reference_forward(question2, params)
    outs_rg = jax.block_until_ready(
        text_double_cnn1d_forward(question2, params, tile_l=8))
    for o, r in zip(outs_rg, refs2):
        assert bool(jnp.allclose(o, r, rtol=1e-4, atol=1e-4)), (
            float(jnp.max(jnp.abs(o - r))))

    # 4) PyTorch NCL layout (B, O, L_out)
    outs_ncl = text_double_cnn1d_forward(question, params, ncl_layout=True)
    for o, k in zip(outs_ncl, SIN_KER_SIZE):
        assert o.shape == (B, TITLE_DIM, L - k + 1), o.shape

    print("KERNEL_OK")
</pallas_src>

<mosaic_0001>
module attributes {stable_mosaic.version = 11 : i64} {
  func.func @_conv_bn_relu_kernel(%arg0: i32, %arg1: i32, %arg2: i32, %arg3: memref<4xi32, #tpu.memory_space<smem>>, %arg4: memref<4xi32, #tpu.memory_space<smem>>, %arg5: memref<1x2x18x8xf32, #tpu.memory_space<vmem>>, %arg6: memref<1x3x8x128xf32, #tpu.memory_space<vmem>>, %arg7: memref<1x2x128xf32, #tpu.memory_space<vmem>>, %arg8: memref<1x2x16x128xf32, #tpu.memory_space<vmem>>, %arg9: memref<2x16x128xf32, #tpu.memory_space<vmem>>, %arg10: memref<1x128xf32, #tpu.memory_space<vmem>>, %arg11: memref<1x128xf32, #tpu.memory_space<vmem>>) attributes {dimension_semantics = [#tpu.dimension_semantics<parallel>, #tpu.dimension_semantics<arbitrary>, #tpu.dimension_semantics<arbitrary>], iteration_bounds = array<i64: 4, 2, 1>, scalar_prefetch = 2 : i64, scratch_operands = 3 : i64, tpu.core_type = #tpu.core_type<tc>, window_params = [{transform_indices = @transform_0, window_bounds = array<i64: 1, 2, 18, 8>}, {transform_indices = @transform_1, window_bounds = array<i64: 1, 3, 8, 128>}, {transform_indices = @transform_2, window_bounds = array<i64: 1, 2, 128>}, {transform_indices = @transform_3, window_bounds = array<i64: 1, 2, 16, 128>}]} {
    %0 = arith.index_cast %arg0 : i32 to index
    %1 = memref.load %arg3[%0] : memref<4xi32, #tpu.memory_space<smem>>
    %2 = arith.index_cast %arg0 : i32 to index
    %3 = memref.load %arg4[%2] : memref<4xi32, #tpu.memory_space<smem>>
    %c16_i32 = arith.constant 16 : i32
    %4 = arith.muli %arg2, %c16_i32 : i32
    %c0 = arith.constant 0 : index
    %c0_0 = arith.constant 0 : index
    %c0_1 = arith.constant 0 : index
    %c0_2 = arith.constant 0 : index
    %5 = vector.load %arg5[%c0, %c0_0, %c0_1, %c0_2] : memref<1x2x18x8xf32, #tpu.memory_space<vmem>>, vector<1x2x16x8xf32>
    %6 = vector.shape_cast %5 : vector<1x2x16x8xf32> to vector<2x16x8xf32>
    %c0_3 = arith.constant 0 : index
    %c0_4 = arith.constant 0 : index
    %c0_5 = arith.constant 0 : index
    %c0_6 = arith.constant 0 : index
    %7 = vector.load %arg6[%c0_3, %c0_4, %c0_5, %c0_6] : memref<1x3x8x128xf32, #tpu.memory_space<vmem>>, vector<1x1x8x128xf32>
    %8 = vector.shape_cast %7 : vector<1x1x8x128xf32> to vector<8x128xf32>
    "tpu.trace_start"() <{level = 10 : i32, message = "ble,eo->blo"}> : () -> ()
    %cst = arith.constant dense<0.000000e+00> : vector<2x16x128xf32>
    %9 = tpu.matmul %6, %8, %cst {dimension_numbers = #tpu.dot_dimension_numbers<[2], [0], [0, 1], [1], [0, 0, 0, 1, 1, 1], [], []>} : vector<2x16x8xf32>, vector<8x128xf32>, vector<2x16x128xf32> -> vector<2x16x128xf32>
    "tpu.trace_stop"() : () -> ()
    %c0_7 = arith.constant 0 : index
    %c0_8 = arith.constant 0 : index
    %c0_9 = arith.constant 0 : index
    %10 = vector.load %arg9[%c0_7, %c0_8, %c0_9] : memref<2x16x128xf32, #tpu.memory_space<vmem>>, vector<2x16x128xf32>
    tpu.vector_store %arg9[%c0_7, %c0_8, %c0_9], %9 {strides = array<i32>} : memref<2x16x128xf32, #tpu.memory_space<vmem>>, vector<2x16x128xf32>,
    %c1_i32 = arith.constant 1 : i32
    %11 = arith.cmpi sgt, %3, %c1_i32 : i32
    %12 = arith.extui %11 : i1 to i32
    %c0_i32 = arith.constant 0 : i32
    %13 = arith.cmpi ne, %12, %c0_i32 : i32
    scf.if %13 {
      %c0_18 = arith.constant 0 : index
      %c0_19 = arith.constant 0 : index
      %c1 = arith.constant 1 : index
      %c0_20 = arith.constant 0 : index
      %28 = vector.load %arg5[%c0_18, %c0_19, %c1, %c0_20] : memref<1x2x18x8xf32, #tpu.memory_space<vmem>>, vector<1x2x16x8xf32>
      %29 = vector.shape_cast %28 : vector<1x2x16x8xf32> to vector<2x16x8xf32>
      %c0_21 = arith.constant 0 : index
      %c1_22 = arith.constant 1 : index
      %c0_23 = arith.constant 0 : index
      %c0_24 = arith.constant 0 : index
      %30 = vector.load %arg6[%c0_21, %c1_22, %c0_23, %c0_24] : memref<1x3x8x128xf32, #tpu.memory_space<vmem>>, vector<1x1x8x128xf32>
      %31 = vector.shape_cast %30 : vector<1x1x8x128xf32> to vector<8x128xf32>
      %c0_25 = arith.constant 0 : index
      %c0_26 = arith.constant 0 : index
      %c0_27 = arith.constant 0 : index
      %32 = vector.load %arg9[%c0_25, %c0_26, %c0_27] : memref<2x16x128xf32, #tpu.memory_space<vmem>>, vector<2x16x128xf32>
      "tpu.trace_start"() <{level = 10 : i32, message = "ble,eo->blo"}> : () -> ()
      %cst_28 = arith.constant dense<0.000000e+00> : vector<2x16x128xf32>
      %33 = tpu.matmul %29, %31, %cst_28 {dimension_numbers = #tpu.dot_dimension_numbers<[2], [0], [0, 1], [1], [0, 0, 0, 1, 1, 1], [], []>} : vector<2x16x8xf32>, vector<8x128xf32>, vector<2x16x128xf32> -> vector<2x16x128xf32>
      "tpu.trace_stop"() : () -> ()
      %34 = arith.addf %32, %33 : vector<2x16x128xf32>
      %c0_29 = arith.constant 0 : index
      %c0_30 = arith.constant 0 : index
      %c0_31 = arith.constant 0 : index
      %35 = vector.load %arg9[%c0_29, %c0_30, %c0_31] : memref<2x16x128xf32, #tpu.memory_space<vmem>>, vector<2x16x128xf32>
      tpu.vector_store %arg9[%c0_29, %c0_30, %c0_31], %34 {strides = array<i32>} : memref<2x16x128xf32, #tpu.memory_space<vmem>>, vector<2x16x128xf32>,
    } else {
    }
    %c2_i32 = arith.constant 2 : i32
    %14 = arith.cmpi sgt, %3, %c2_i32 : i32
    %15 = arith.extui %14 : i1 to i32
    %c0_i32_10 = arith.constant 0 : i32
    %16 = arith.cmpi ne, %15, %c0_i32_10 : i32
    scf.if %16 {
      %c0_18 = arith.constant 0 : index
      %c0_19 = arith.constant 0 : index
      %c2 = arith.constant 2 : index
      %c0_20 = arith.constant 0 : index
      %28 = vector.load %arg5[%c0_18, %c0_19, %c2, %c0_20] : memref<1x2x18x8xf32, #tpu.memory_space<vmem>>, vector<1x2x16x8xf32>
      %29 = vector.shape_cast %28 : vector<1x2x16x8xf32> to vector<2x16x8xf32>
      %c0_21 = arith.constant 0 : index
      %c2_22 = arith.constant 2 : index
      %c0_23 = arith.constant 0 : index
      %c0_24 = arith.constant 0 : index
      %30 = vector.load %arg6[%c0_21, %c2_22, %c0_23, %c0_24] : memref<1x3x8x128xf32, #tpu.memory_space<vmem>>, vector<1x1x8x128xf32>
      %31 = vector.shape_cast %30 : vector<1x1x8x128xf32> to vector<8x128xf32>
      %c0_25 = arith.constant 0 : index
      %c0_26 = arith.constant 0 : index
      %c0_27 = arith.constant 0 : index
      %32 = vector.load %arg9[%c0_25, %c0_26, %c0_27] : memref<2x16x128xf32, #tpu.memory_space<vmem>>, vector<2x16x128xf32>
      "tpu.trace_start"() <{level = 10 : i32, message = "ble,eo->blo"}> : () -> ()
      %cst_28 = arith.constant dense<0.000000e+00> : vector<2x16x128xf32>
      %33 = tpu.matmul %29, %31, %cst_28 {dimension_numbers = #tpu.dot_dimension_numbers<[2], [0], [0, 1], [1], [0, 0, 0, 1, 1, 1], [], []>} : vector<2x16x8xf32>, vector<8x128xf32>, vector<2x16x128xf32> -> vector<2x16x128xf32>
      "tpu.trace_stop"() : () -> ()
      %34 = arith.addf %32, %33 : vector<2x16x128xf32>
      %c0_29 = arith.constant 0 : index
      %c0_30 = arith.constant 0 : index
      %c0_31 = arith.constant 0 : index
      %35 = vector.load %arg9[%c0_29, %c0_30, %c0_31] : memref<2x16x128xf32, #tpu.memory_space<vmem>>, vector<2x16x128xf32>
      tpu.vector_store %arg9[%c0_29, %c0_30, %c0_31], %34 {strides = array<i32>} : memref<2x16x128xf32, #tpu.memory_space<vmem>>, vector<2x16x128xf32>,
    } else {
    }
    %c0_i32_11 = arith.constant 0 : i32
    %17 = arith.cmpi eq, %arg1, %c0_i32_11 : i32
    %c0_i32_12 = arith.constant 0 : i32
    %18 = arith.cmpi eq, %arg2, %c0_i32_12 : i32
    %19 = arith.andi %17, %18 : i1
    %20 = arith.extui %19 : i1 to i32
    %c0_i32_13 = arith.constant 0 : i32
    %21 = arith.cmpi ne, %20, %c0_i32_13 : i32
    scf.if %21 {
      %cst_18 = arith.constant 0.000000e+00 : f32
      %28 = vector.broadcast %cst_18 : f32 to vector<1x128xf32>
      %c0_19 = arith.constant 0 : index
      %c0_20 = arith.constant 0 : index
      %29 = vector.load %arg10[%c0_19, %c0_20] : memref<1x128xf32, #tpu.memory_space<vmem>>, vector<1x128xf32>
      tpu.vector_store %arg10[%c0_19, %c0_20], %28 {strides = array<i32>} : memref<1x128xf32, #tpu.memory_space<vmem>>, vector<1x128xf32>,
      %cst_21 = arith.constant 0.000000e+00 : f32
      %30 = vector.broadcast %cst_21 : f32 to vector<1x128xf32>
      %c0_22 = arith.constant 0 : index
      %c0_23 = arith.constant 0 : index
      %31 = vector.load %arg11[%c0_22, %c0_23] : memref<1x128xf32, #tpu.memory_space<vmem>>, vector<1x128xf32>
      tpu.vector_store %arg11[%c0_22, %c0_23], %30 {strides = array<i32>} : memref<1x128xf32, #tpu.memory_space<vmem>>, vector<1x128xf32>,
    } else {
    }
    %c0_i32_14 = arith.constant 0 : i32
    %22 = arith.cmpi eq, %arg1, %c0_i32_14 : i32
    %23 = arith.extui %22 : i1 to i32
    %c0_i32_15 = arith.constant 0 : i32
    %24 = arith.cmpi ne, %23, %c0_i32_15 : i32
    scf.if %24 {
      %c0_18 = arith.constant 0 : index
      %c0_19 = arith.constant 0 : index
      %c0_20 = arith.constant 0 : index
      %28 = vector.load %arg9[%c0_18, %c0_19, %c0_20] : memref<2x16x128xf32, #tpu.memory_space<vmem>>, vector<2x16x128xf32>
      %c16_i32_21 = arith.constant 16 : i32
      %29 = arith.cmpi slt, %1, %c16_i32_21 : i32
      %c16_i32_22 = arith.constant 16 : i32
      %30 = arith.addi %4, %c16_i32_22 : i32
      %31 = arith.cmpi slt, %1, %30 : i32
      %c16_i32_23 = arith.constant 16 : i32
      %32 = arith.cmpi slt, %4, %c16_i32_23 : i32
      %33 = arith.andi %31, %32 : i1
      %34 = arith.andi %29, %33 : i1
      %true = arith.constant true
      %35 = arith.xori %34, %true : i1
      %36 = arith.extui %35 : i1 to i32
      %c0_i32_24 = arith.constant 0 : i32
      %37 = arith.cmpi ne, %36, %c0_i32_24 : i32
      scf.if %37 {
        %c0_26 = arith.constant 0 : index
        %c0_27 = arith.constant 0 : index
        %40 = vector.load %arg10[%c0_26, %c0_27] : memref<1x128xf32, #tpu.memory_space<vmem>>, vector<1x128xf32>
        %cst_28 = arith.constant dense<0.000000e+00> : vector<128xf32>
        %41 = vector.multi_reduction <add>, %28, %cst_28 [0, 1] : vector<2x16x128xf32> to vector<128xf32>
        %42 = vector.shape_cast %41 : vector<128xf32> to vector<1x1x128xf32>
        %43 = vector.shape_cast %42 : vector<1x1x128xf32> to vector<1x128xf32>
        %44 = arith.addf %40, %43 : vector<1x128xf32>
        %c0_29 = arith.constant 0 : index
        %c0_30 = arith.constant 0 : index
        %45 = vector.load %arg10[%c0_29, %c0_30] : memref<1x128xf32, #tpu.memory_space<vmem>>, vector<1x128xf32>
        tpu.vector_store %arg10[%c0_29, %c0_30], %44 {strides = array<i32>} : memref<1x128xf32, #tpu.memory_space<vmem>>, vector<1x128xf32>,
        %c0_31 = arith.constant 0 : index
        %c0_32 = arith.constant 0 : index
        %46 = vector.load %arg11[%c0_31, %c0_32] : memref<1x128xf32, #tpu.memory_space<vmem>>, vector<1x128xf32>
        %47 = arith.mulf %28, %28 : vector<2x16x128xf32>
        %cst_33 = arith.constant dense<0.000000e+00> : vector<128xf32>
        %48 = vector.multi_reduction <add>, %47, %cst_33 [0, 1] : vector<2x16x128xf32> to vector<128xf32>
        %49 = vector.shape_cast %48 : vector<128xf32> to vector<1x1x128xf32>
        %50 = vector.shape_cast %49 : vector<1x1x128xf32> to vector<1x128xf32>
        %51 = arith.addf %46, %50 : vector<1x128xf32>
        %c0_34 = arith.constant 0 : index
        %c0_35 = arith.constant 0 : index
        %52 = vector.load %arg11[%c0_34, %c0_35] : memref<1x128xf32, #tpu.memory_space<vmem>>, vector<1x128xf32>
        tpu.vector_store %arg11[%c0_34, %c0_35], %51 {strides = array<i32>} : memref<1x128xf32, #tpu.memory_space<vmem>>, vector<1x128xf32>,
      } else {
      }
      %38 = arith.extui %34 : i1 to i32
      %c0_i32_25 = arith.constant 0 : i32
      %39 = arith.cmpi ne, %38, %c0_i32_25 : i32
      scf.if %39 {
        %40 = tpu.iota {dimensions = array<i32: 1>} : vector<1x16x1xi32>
        %41 = arith.subi %1, %4 : i32
        %42 = vector.broadcast %41 : i32 to vector<1x16x1xi32>
        %43 = arith.cmpi slt, %40, %42 : vector<1x16x1xi32>
        %44 = arith.extui %43 : vector<1x16x1xi1> to vector<1x16x1xi32>
        %45 = arith.sitofp %44 : vector<1x16x1xi32> to vector<1x16x1xf32>
        %46 = vector.broadcast %45 : vector<1x16x1xf32> to vector<2x16x128xf32>
        %47 = arith.mulf %28, %46 : vector<2x16x128xf32>
        %c0_26 = arith.constant 0 : index
        %c0_27 = arith.constant 0 : index
        %48 = vector.load %arg10[%c0_26, %c0_27] : memref<1x128xf32, #tpu.memory_space<vmem>>, vector<1x128xf32>
        %cst_28 = arith.constant dense<0.000000e+00> : vector<128xf32>
        %49 = vector.multi_reduction <add>, %47, %cst_28 [0, 1] : vector<2x16x128xf32> to vector<128xf32>
        %50 = vector.shape_cast %49 : vector<128xf32> to vector<1x1x128xf32>
        %51 = vector.shape_cast %50 : vector<1x1x128xf32> to vector<1x128xf32>
        %52 = arith.addf %48, %51 : vector<1x128xf32>
        %c0_29 = arith.constant 0 : index
        %c0_30 = arith.constant 0 : index
        %53 = vector.load %arg10[%c0_29, %c0_30] : memref<1x128xf32, #tpu.memory_space<vmem>>, vector<1x128xf32>
        tpu.vector_store %arg10[%c0_29, %c0_30], %52 {strides = array<i32>} : memref<1x128xf32, #tpu.memory_space<vmem>>, vector<1x128xf32>,
        %c0_31 = arith.constant 0 : index
        %c0_32 = arith.constant 0 : index
        %54 = vector.load %arg11[%c0_31, %c0_32] : memref<1x128xf32, #tpu.memory_space<vmem>>, vector<1x128xf32>
        %55 = arith.mulf %47, %28 : vector<2x16x128xf32>
        %cst_33 = arith.constant dense<0.000000e+00> : vector<128xf32>
        %56 = vector.multi_reduction <add>, %55, %cst_33 [0, 1] : vector<2x16x128xf32> to vector<128xf32>
        %57 = vector.shape_cast %56 : vector<128xf32> to vector<1x1x128xf32>
        %58 = vector.shape_cast %57 : vector<1x1x128xf32> to vector<1x128xf32>
        %59 = arith.addf %54, %58 : vector<1x128xf32>
        %c0_34 = arith.constant 0 : index
        %c0_35 = arith.constant 0 : index
        %60 = vector.load %arg11[%c0_34, %c0_35] : memref<1x128xf32, #tpu.memory_space<vmem>>, vector<1x128xf32>
        tpu.vector_store %arg11[%c0_34, %c0_35], %59 {strides = array<i32>} : memref<1x128xf32, #tpu.memory_space<vmem>>, vector<1x128xf32>,
      } else {
      }
    } else {
    }
    %c1_i32_16 = arith.constant 1 : i32
    %25 = arith.cmpi eq, %arg1, %c1_i32_16 : i32
    %26 = arith.extui %25 : i1 to i32
    %c0_i32_17 = arith.constant 0 : i32
    %27 = arith.cmpi ne, %26, %c0_i32_17 : i32
    scf.if %27 {
      %28 = arith.sitofp %1 : i32 to f32
      %cst_18 = arith.constant 2.000000e+00 : f32
      %29 = arith.mulf %cst_18, %28 : f32
      %cst_19 = arith.constant 1.000000e+00 : f32
      %30 = arith.divf %cst_19, %29 : f32
      %c0_20 = arith.constant 0 : index
      %c0_21 = arith.constant 0 : index
      %31 = vector.load %arg10[%c0_20, %c0_21] : memref<1x128xf32, #tpu.memory_space<vmem>>, vector<1x128xf32>
      %32 = vector.broadcast %30 : f32 to vector<1x128xf32>
      %33 = arith.mulf %31, %32 : vector<1x128xf32>
      %34 = vector.shape_cast %33 : vector<1x128xf32> to vector<1x1x128xf32>
      %c0_22 = arith.constant 0 : index
      %c0_23 = arith.constant 0 : index
      %35 = vector.load %arg11[%c0_22, %c0_23] : memref<1x128xf32, #tpu.memory_space<vmem>>, vector<1x128xf32>
      %36 = vector.broadcast %30 : f32 to vector<1x128xf32>
      %37 = arith.mulf %35, %36 : vector<1x128xf32>
      %38 = vector.shape_cast %37 : vector<1x128xf32> to vector<1x1x128xf32>
      %39 = arith.mulf %34, %34 : vector<1x1x128xf32>
      %40 = arith.subf %38, %39 : vector<1x1x128xf32>
      %cst_24 = arith.constant 0.000000e+00 : f32
      %41 = vector.broadcast %cst_24 : f32 to vector<1x1x128xf32>
      %42 = arith.maximumf %40, %41 : vector<1x1x128xf32>
      %c0_25 = arith.constant 0 : index
      %c0_26 = arith.constant 0 : index
      %c0_27 = arith.constant 0 : index
      %43 = vector.load %arg7[%c0_25, %c0_26, %c0_27] : memref<1x2x128xf32, #tpu.memory_space<vmem>>, vector<1x1x128xf32>
      %44 = vector.shape_cast %43 : vector<1x1x128xf32> to vector<1x128xf32>
      %45 = vector.shape_cast %44 : vector<1x128xf32> to vector<1x1x128xf32>
      %c0_28 = arith.constant 0 : index
      %c1 = arith.constant 1 : index
      %c0_29 = arith.constant 0 : index
      %46 = vector.load %arg7[%c0_28, %c1, %c0_29] : memref<1x2x128xf32, #tpu.memory_space<vmem>>, vector<1x1x128xf32>
      %47 = vector.shape_cast %46 : vector<1x1x128xf32> to vector<1x128xf32>
      %48 = vector.shape_cast %47 : vector<1x128xf32> to vector<1x1x128xf32>
      %cst_30 = arith.constant 9.99999974E-6 : f32
      %49 = vector.broadcast %cst_30 : f32 to vector<1x1x128xf32>
      %50 = arith.addf %42, %49 : vector<1x1x128xf32>
      %51 = math.rsqrt %50 : vector<1x1x128xf32>
      %52 = arith.mulf %45, %51 : vector<1x1x128xf32>
      %53 = arith.mulf %34, %52 : vector<1x1x128xf32>
      %54 = arith.subf %48, %53 : vector<1x1x128xf32>
      %c0_31 = arith.constant 0 : index
      %c0_32 = arith.constant 0 : index
      %c0_33 = arith.constant 0 : index
      %55 = vector.load %arg9[%c0_31, %c0_32, %c0_33] : memref<2x16x128xf32, #tpu.memory_space<vmem>>, vector<2x16x128xf32>
      %56 = vector.broadcast %52 : vector<1x1x128xf32> to vector<2x16x128xf32>
      %57 = arith.mulf %55, %56 : vector<2x16x128xf32>
      %58 = vector.broadcast %54 : vector<1x1x128xf32> to vector<2x16x128xf32>
      %59 = arith.addf %57, %58 : vector<2x16x128xf32>
      %cst_34 = arith.constant 0.000000e+00 : f32
      %60 = vector.broadcast %cst_34 : f32 to vector<2x16x128xf32>
      %61 = arith.maximumf %59, %60 : vector<2x16x128xf32>
      %c0_35 = arith.constant 0 : index
      %c0_36 = arith.constant 0 : index
      %c0_37 = arith.constant 0 : index
      %c0_38 = arith.constant 0 : index
      %62 = vector.load %arg8[%c0_35, %c0_36, %c0_37, %c0_38] : memref<1x2x16x128xf32, #tpu.memory_space<vmem>>, vector<1x2x16x128xf32>
      %63 = vector.shape_cast %62 : vector<1x2x16x128xf32> to vector<2x16x128xf32>
      %64 = vector.shape_cast %61 : vector<2x16x128xf32> to vector<1x2x16x128xf32>
      tpu.vector_store %arg8[%c0_35, %c0_36, %c0_37, %c0_38], %64 {strides = array<i32>} : memref<1x2x16x128xf32, #tpu.memory_space<vmem>>, vector<1x2x16x128xf32>,
    } else {
    }
    return
  }
  func.func @transform_0(%arg0: i32, %arg1: i32, %arg2: i32, %arg3: memref<4xi32, #tpu.memory_space<smem>>, %arg4: memref<4xi32, #tpu.memory_space<smem>>) -> (i32, i32, i32, i32) {
    %c0_i32 = arith.constant 0 : i32
    %c0_i32_0 = arith.constant 0 : i32
    %c0_i32_1 = arith.constant 0 : i32
    %c0_i32_2 = arith.constant 0 : i32
    return %arg2, %c0_i32, %c0_i32_0, %c0_i32_1 : i32, i32, i32, i32
  }
  func.func @transform_1(%arg0: i32, %arg1: i32, %arg2: i32, %arg3: memref<4xi32, #tpu.memory_space<smem>>, %arg4: memref<4xi32, #tpu.memory_space<smem>>) -> (i32, i32, i32, i32) {
    %c0_i32 = arith.constant 0 : i32
    %c0_i32_0 = arith.constant 0 : i32
    %c0_i32_1 = arith.constant 0 : i32
    %c0_i32_2 = arith.constant 0 : i32
    return %arg0, %c0_i32, %c0_i32_0, %c0_i32_1 : i32, i32, i32, i32
  }
  func.func @transform_2(%arg0: i32, %arg1: i32, %arg2: i32, %arg3: memref<4xi32, #tpu.memory_space<smem>>, %arg4: memref<4xi32, #tpu.memory_space<smem>>) -> (i32, i32, i32) {
    %c0_i32 = arith.constant 0 : i32
    %c0_i32_0 = arith.constant 0 : i32
    %c0_i32_1 = arith.constant 0 : i32
    return %arg0, %c0_i32, %c0_i32_0 : i32, i32, i32
  }
  func.func @transform_3(%arg0: i32, %arg1: i32, %arg2: i32, %arg3: memref<4xi32, #tpu.memory_space<smem>>, %arg4: memref<4xi32, #tpu.memory_space<smem>>) -> (i32, i32, i32, i32) {
    %0 = arith.muli %arg2, %arg1 : i32
    %c0_i32 = arith.constant 0 : i32
    %c0_i32_0 = arith.constant 0 : i32
    %c0_i32_1 = arith.constant 0 : i32
    return %arg0, %c0_i32, %0, %c0_i32_0 : i32, i32, i32, i32
  }
}

</mosaic_0001>

<bundles_post_ra>
// kernel: tpu_custom_call.1
= control target key start
LH: loop header
LB: loop body
LE: loop exit
PB: predicated region body
PF: predicated region fallthrough
CT: control target
= control target key end

     0   :  { %s1050_s24 = smov [#allocation6]   ;;  %s1051_s25 = smov [#allocation7]   ;;  %s1324_s0 = inlined_call_operand.vmem [shape: s32[4], index: 0, kind: input, shape index: {}]   ;;  %s1325_s2 = inlined_call_operand.vmem [shape: f32[1,2,18,8], index: 2, kind: input, shape index: {}]   ;;  %s1326_s3 = inlined_call_operand.hbm [shape: f32[4,3,8,128], index: 3, kind: input, shape index: {}]   ;;  %s1327_s4 = inlined_call_operand.vmem [shape: f32[4,2,128], index: 4, kind: input, shape index: {}]   ;;  %s1328_s5 = inlined_call_operand.hbm [shape: f32[4,2,16,128], index: 5, kind: output, shape index: {}]   ;;  %s1329_s1 = inlined_call_operand.vmem [shape: s32[4], index: 1, kind: input, shape index: {}]  }
   0x1   :  { %1331 = sst [smem:[#allocation17_spill]] %s1326_s3  ;;  %s11_s20 = sshll.u32 %s1324_s0, 4  ;;  %s12_s20 = int_to_ptr.vmem [resolvable:$true] %s11_s20 }
   0x2   :  { %s16_s23 = sshll.u32 %s1329_s1, 4  ;;  %s17_s23 = int_to_ptr.vmem [resolvable:$true] %s16_s23 }
   0x3   :  { %14 = dma.vmem_to_smem %s12_s20, 16, %s1050_s24, [#allocation5] }
   0x4   :  { %19 = dma.vmem_to_smem %s17_s23, 16, %s1051_s25, [#allocation5] }
   0x5   :  { %1008 = dma.done.wait [#allocation5], 32 }
   0x6   :  { %1009 = vsyncadd [#allocation5], 4294967264 }
   0x7   :  { %22 = sfence }
   0x8   :  { %23 = vsyncpa [#allocation9], 0 }
   0x9   :  { %25 = vsyncpa [#allocation9 + $0x1], 0 }
   0xa   :  { %26 = vsyncpa [#allocation10], 0 }
   0xb   :  { %28 = vsyncpa [#allocation10 + $0x1], 0  ;;  %s1094_s26 = smov 0   ;;  %s1096_s0 = smov 0  }
   0xc   :  { %s1098_s27 = smov 0   ;;  %s1100_s1 = smov 0  }
   0xd   :  { %s1102_s28 = smov 0   ;;  %s1104_s29 = smov 0  }
   0xe   :  { %s1106_s30 = smov 0   ;;  %s1108_s6 = smov 0  }
   0xf LB: > { %s751_s7 = sadd.s32 4294967295, %s1048_s6   ;;  %s752_s8 = sadd.s32 4294967294, %s1048_s6   ;;  %s1048_s6 = sphi %s1108_s6, %s34_s6   ;;  %s1044_s30 = sphi %s1106_s30, %s1348_s30   ;;  %s1040_s29 = sphi %s1104_s29, %s1347_s29   ;;  %s1036_s28 = sphi %s1102_s28, %s1346_s28   ;;  %s1032_s1 = sphi %s1100_s1, %s1345_s1   ;;  %s1028_s27 = sphi %s1098_s27, %s1344_s27   ;;  %s1024_s0 = sphi %s1096_s0, %s1343_s0   ;;  %s1020_s26 = sphi %s1094_s26, %s1342_s26  }
  0x10   : > { %s49_s9 = sadd.s32 1, %s1040_s29  ;;  %s53_s10 = sadd.s32 1, %s1044_s30 }
  0x11   : > { %p51_p0 = scmp.ge.s32.totalorder %s49_s9, 2  ;;  %s86_s11 = sadd.s32 1, %s1028_s27 }
  0x12   : > { %p93_p1 = scmp.ne.s32.totalorder %s1028_s27, %s1024_s0  ;;  %p94_p2 = scmp.eq.s32.totalorder %s1048_s6, 0 }
  0x13   : > { %s1350_s9 = smov (%p51_p0, %s49_s9), 0  ;;  %s1352_s10 = smov (!%p51_p0, %s53_s10), %s1044_s30 }
  0x14   : > { %1332 = sst [smem:[#allocation15_spill]] %s1350_s9  ;;  %p1145_p3 = por %p94_p2, %p93_p1 }
  0x15   : > { %p99_p4 = scmp.ne.s32.totalorder %s1024_s0, %s1020_s26  ;;  %p55_p5 = scmp.ge.s32.totalorder %s1352_s10, 4 }
  0x16   : > { %p100_p6 = scmp.eq.s32.totalorder %s751_s7, 0  ;;  %p153_p7 = scmp.eq.s32.totalorder %s751_s7, 7 }
  0x17   : > { %p159_p8 = scmp.eq.s32.totalorder %s752_s8, 7  ;;  %s1354_s10 = smov (%p55_p5, %s1352_s10), 0 }
  0x18   : > { %1334 = sst [smem:[#allocation16_spill]] %s1354_s10  ;;  %p1153_p9 = por %p100_p6, %p99_p4 }
  0x19   : > { %p1157_p10 = por %p153_p7, %p93_p1  ;;  %s83_s15 = ssub.s32 %s1044_s30, %s1354_s10 }
  0x1a   : > { %p1163_p11 = por %p159_p8, %p99_p4  ;;  %p84_p12 = scmp.eq.s32.totalorder %s83_s15, 0 }
  0x1b   : > { %p816_p13 = scmp.lt.s32.totalorder %s1048_s6, 8  ;;  %s187_s17 = sand.u32 1, %s1028_s27  }
  0x1c   : > { %s1170_s18 = scalar_select %p84_p12, %s1028_s27, %s86_s11  }
  0x1d   : > { %s799_s19 = smul.u32 24, %s187_s17  ;;  %p809_p0 = pnand %p816_p13, %p1145_p3 }
  0x1e   : > { %s800_s20 = smul.u32 24, %s1044_s30  ;;  %s1338_s3 = sld [smem:[#allocation17_spill]] }
  0x1f   : > { %s191_s24 = scalar_lea.vmem [#allocation8], %s799_s19  ;;  %p757_p1 = scmp.ge.s32.totalorder %s1048_s6, 1 }
  0x20   : > { %s199_s25 = sshll.u32 %s191_s24, 4  ;;  %s188_s8 = scalar_lea.sflag [#allocation9], %s187_s17  ;;  %s200_s25 = int_to_ptr.vmem [resolvable:$true] %s199_s25 }
  0x21   : > { %s1052_s15 = smov 128   ;;  %s1053_s10 = smov 8  }
  0x22   : > { %p214_p2 = scmp.lt.s32.totalorder %s1048_s6, 9 }
  0x24   : > { %s196_s23 = scalar_lea.hbm %s1338_s3, %s800_s20  ;;  %p215_p4 = pnand %p757_p1, %p214_p2 }
  0x25   : > { %s197_s7 = sshll.u32 %s196_s23, 4  ;;  %s1181_s11 = sand.u32 (!%p215_p4), 1, %s1024_s0   ;;  %s198_s7 = int_to_ptr.hbm [resolvable:$true] %s197_s7 }
  0x26   : > { %811 = dma.hbm_to_vmem [thread:$0]  (!%p809_p0), %s198_s7, 384, %s200_s25, %s188_s8, %s1052_s15, %s1052_s15, %s1053_s10  }
  0x27   : > { %218 = sbr.rel (%p215_p4) target bundleno = 675 (0x2a3), region = 32  ;;  %s221_s19 = scalar_lea.sflag (!%p215_p4), [#allocation9], %s1181_s11 }
  0x28   : > { %s801_s12 = smul.u32 (!%p215_p4), 24, %s1181_s11 }
  0x2a   : > { %s1185_s20 = scalar_lea.vmem (!%p215_p4), [#allocation8], %s801_s12 }
  0x2c   : > { %1011 = dma.done.wait (%p1153_p9), %s221_s19, 384  }
  0x2d   : > { %1013 = vsyncadd (%p1153_p9), %s221_s19, 4294966912  ;;  %s758_s10 = sshll.u32 %s1181_s11, 5  ;;  %p262_p3 = scmp.lt.s32.totalorder %s1036_s28, 3  ;;  %vm276_vm0 = vcmask 64512   ;;  %v275_v0 = vld [vmem:[%s1185_s20] sm:$0xff] }
  0x2e   : > { %s1194_s17 = sld [smem:[#allocation6 + %s1036_s28]]  ;;  %v273_v1 = vld [vmem:[%s1325_s2 + $0x18] sm:$0xff]  ;;  %v274_v2 = vld [vmem:[%s1325_s2 + $0x20] sm:$0xff]  ;;  %791 = vmatpush.msra.mxu2 %v275_v0  ;;  %792 = vmatpush.msra.mxu3 %v275_v0  ;;  %v272_v4 = vld [vmem:[%s1325_s2 + $0x8] sm:$0xff]  ;;  %s1222_s3 = scalar_lea.vmem [#allocation11], %s758_s10 }
  0x2f   : > { %s1197_s21 = sld [smem:[#allocation7 + %s1036_s28]]  ;;  %v271_v3 = vld [vmem:[%s1325_s2] sm:$0xff]  ;;  %762 = vmatmul.msk.f32.vlgmr.msra.gmra.mxu2 %vm276_vm0, %v273_v1  ;;  %763 = vmatmul.msk.f32.vlgmr.msra.gmra.mxu3 %vm276_vm0, %v274_v2 }
  0x30   : > { %s263_s22 = scalar_select %p262_p3, %s1036_s28, 3  ;;  %304 = vmatpush.msra.mxu0 %v275_v0  ;;  %790 = vmatpush.msra.mxu1 %v275_v0 }
  0x31   : > { %760 = vmatmul.msk.f32.vlgmr.msra.gmra.mxu0 %vm276_vm0, %v271_v3  ;;  %761 = vmatmul.msk.f32.vlgmr.msra.gmra.mxu1 %vm276_vm0, %v272_v4 }
  0x32   : > { %s759_s23 = sshll.u32 %s263_s22, 1 }
  0x33   : > { %s1203_s13 = scalar_lea.vmem %s1327_s4, %s759_s23 }
  0x35   : > { %p764_p5 = scmp.le.s32.totalorder %s1197_s21, 1 }
  0xae   : > { %v306_v5 = vpop.f32.mrf.mxu0  ;;  %v309_v6 = vpop.f32.mrf.mxu1 }
  0xaf   : > { %318 = vst [vmem:[#allocation2 + $0x10] sm:$0xff] %v306_v5 }
  0xb0   : > { %319 = vst [vmem:[#allocation2] sm:$0xff] %v309_v6  ;;  %325 = sbr.rel (%p764_p5) target bundleno = 319 (0x13f), region = 40 }
  0xb2   : > { %v312_v7 = vpop.f32.mrf.mxu2  ;;  %v315_v8 = vpop.f32.mrf.mxu3 }
  0xb3   : > { %320 = vst [vmem:[#allocation2 + $0x18] sm:$0xff] %v312_v7 }
  0xb4   : > { %321 = vst [vmem:[#allocation2 + $0x8] sm:$0xff] %v315_v8 }
  0xb5   : > { %v765_v9 = vld [vmem:[%s1185_s20 + $0x8] sm:$0xff]  ;;  %v328_v10 = vld [vmem:[%s1325_s2 + $0x19] sm:$0xff] }
  0xb6   : > { %v329_v11 = vld [vmem:[%s1325_s2 + $0x21] sm:$0xff]  ;;  %794 = vmatpush.msra.mxu2 %v765_v9  ;;  %795 = vmatpush.msra.mxu3 %v765_v9  ;;  %v327_v13 = vld [vmem:[%s1325_s2 + $0x9] sm:$0xff] }
  0xb7   : > { %v326_v12 = vld [vmem:[%s1325_s2 + $0x1] sm:$0xff]  ;;  %768 = vmatmul.msk.f32.vlgmr.msra.gmra.mxu2 %vm276_vm0, %v328_v10  ;;  %769 = vmatmul.msk.f32.vlgmr.msra.gmra.mxu3 %vm276_vm0, %v329_v11  ;;  %v332_v14 = vld [vmem:[#allocation2 + $0x10] sm:$0xff] }
  0xb8   : > { %363 = vmatpush.msra.mxu0 %v765_v9  ;;  %793 = vmatpush.msra.mxu1 %v765_v9  ;;  %v333_v15 = vld [vmem:[#allocation2] sm:$0xff] }
  0xb9   : > { %766 = vmatmul.msk.f32.vlgmr.msra.gmra.mxu0 %vm276_vm0, %v326_v12  ;;  %767 = vmatmul.msk.f32.vlgmr.msra.gmra.mxu1 %vm276_vm0, %v327_v13 }
  0xba   : > { %v334_v20 = vld [vmem:[#allocation2 + $0x18] sm:$0xff] }
  0xbb   : > { %v335_v21 = vld [vmem:[#allocation2 + $0x8] sm:$0xff] }
 0x136   : > { %v365_v16 = vpop.f32.mrf.mxu0  ;;  %v368_v17 = vpop.f32.mrf.mxu1 }
 0x137   : > { %v377_v18 = vadd.f32 %v365_v16, %v332_v14  ;;  %v378_v19 = vadd.f32 %v368_v17, %v333_v15 }
 0x139   : > { %381 = vst [vmem:[#allocation2 + $0x10] sm:$0xff] %v377_v18 }
 0x13a   : > { %382 = vst [vmem:[#allocation2] sm:$0xff] %v378_v19  ;;  %v371_v22 = vpop.f32.mrf.mxu2  ;;  %v374_v23 = vpop.f32.mrf.mxu3 }
 0x13b   : > { %v379_v24 = vadd.f32 %v371_v22, %v334_v20  ;;  %v380_v25 = vadd.f32 %v374_v23, %v335_v21 }
 0x13d   : > { %383 = vst [vmem:[#allocation2 + $0x18] sm:$0xff] %v379_v24 }
 0x13e   : > { %384 = vst [vmem:[#allocation2 + $0x8] sm:$0xff] %v380_v25 }
 0x13f PF: > { %p770_p6 = scmp.le.s32.totalorder %s1197_s21, 2 }
 0x141   : > { %388 = sbr.rel (%p770_p6) target bundleno = 464 (0x1d0), region = 44 }
 0x146   : > { %v771_v26 = vld [vmem:[%s1185_s20 + $0x10] sm:$0xff]  ;;  %v391_v27 = vld [vmem:[%s1325_s2 + $0x1a] sm:$0xff]  ;;  %v392_v28 = vld [vmem:[%s1325_s2 + $0x22] sm:$0xff] }
 0x147   : > { %797 = vmatpush.msra.mxu2 %v771_v26  ;;  %798 = vmatpush.msra.mxu3 %v771_v26  ;;  %v389_v29 = vld [vmem:[%s1325_s2 + $0x2] sm:$0xff]  ;;  %v390_v30 = vld [vmem:[%s1325_s2 + $0xa] sm:$0xff]  ;;  %v397_v37 = vld [vmem:[#allocation2 + $0x18] sm:$0xff] }
 0x148   : > { %774 = vmatmul.msk.f32.vlgmr.msra.gmra.mxu2 %vm276_vm0, %v391_v27  ;;  %775 = vmatmul.msk.f32.vlgmr.msra.gmra.mxu3 %vm276_vm0, %v392_v28  ;;  %v395_v31 = vld [vmem:[#allocation2 + $0x10] sm:$0xff]  ;;  %v396_v32 = vld [vmem:[#allocation2] sm:$0xff]  ;;  %v398_v38 = vld [vmem:[#allocation2 + $0x8] sm:$0xff] }
 0x149   : > { %426 = vmatpush.msra.mxu0 %v771_v26  ;;  %796 = vmatpush.msra.mxu1 %v771_v26 }
 0x14a   : > { %772 = vmatmul.msk.f32.vlgmr.msra.gmra.mxu0 %vm276_vm0, %v389_v29  ;;  %773 = vmatmul.msk.f32.vlgmr.msra.gmra.mxu1 %vm276_vm0, %v390_v30 }
 0x1c7   : > { %v428_v33 = vpop.f32.mrf.mxu0  ;;  %v431_v34 = vpop.f32.mrf.mxu1 }
 0x1c8   : > { %v440_v35 = vadd.f32 %v428_v33, %v395_v31  ;;  %v441_v36 = vadd.f32 %v431_v34, %v396_v32 }
 0x1ca   : > { %444 = vst [vmem:[#allocation2 + $0x10] sm:$0xff] %v440_v35 }
 0x1cb   : > { %445 = vst [vmem:[#allocation2] sm:$0xff] %v441_v36  ;;  %v434_v39 = vpop.f32.mrf.mxu2  ;;  %v437_v40 = vpop.f32.mrf.mxu3 }
 0x1cc   : > { %v442_v41 = vadd.f32 %v434_v39, %v397_v37  ;;  %v443_v42 = vadd.f32 %v437_v40, %v398_v38 }
 0x1ce   : > { %446 = vst [vmem:[#allocation2 + $0x18] sm:$0xff] %v442_v41 }
 0x1cf   : > { %447 = vst [vmem:[#allocation2 + $0x8] sm:$0xff] %v443_v42 }
 0x1d0 PF: > { %p448_p7 = scmp.eq.s32.totalorder %s1032_s1, 0 }
 0x1d1   : > { %v1054_v43 = vmov (%p448_p7), 0.0  }
 0x1d2   : > { %453 = sbr.rel (!%p448_p7) target bundleno = 471 (0x1d7), region = 48  ;;  %454 = vst [vmem:[#allocation3] sm:$0x1] (%p448_p7), %v1054_v43 }
 0x1d3   : > { %455 = vst [vmem:[#allocation4] sm:$0x1] (%p448_p7), %v1054_v43 }
 0x1d7 PF: > { %p777_p8 = scmp.ne.s32.totalorder %s1032_s1, 0 }
 0x1d8   : > { %p463_p9 = scmp.lt.s32.totalorder (!%p777_p8), %s1194_s17, 16 }
 0x1d9   : > { %458 = sbr.rel (%p777_p8) target bundleno = 539 (0x21b), region = 52 }
 0x1da   : > { %p1263_p12 = pnand (!%p777_p8), %p463_p9, %p463_p9 }
 0x1de   : > { %v459_v44 = vld [vmem:[#allocation2 + $0x10] sm:$0xff]  ;;  %v460_v45 = vld [vmem:[#allocation2] sm:$0xff]  ;;  %v461_v46 = vld [vmem:[#allocation2 + $0x18] sm:$0xff]  ;;  %472 = sbr.rel (%p1263_p12) target bundleno = 516 (0x204), region = 56 }
 0x1df   : > { %v462_v47 = vld [vmem:[#allocation2 + $0x8] sm:$0xff] }
 0x1e3   : > { %v473_v48 = vlaneseq  ;;  %v477_v49 = vstv %s1194_s17  ;;  %v1055_v52 = vmov 0.0   ;;  %v488_v14 = vld [vmem:[#allocation3] sm:$0x1]  ;;  %v500_v17 = vld [vmem:[#allocation4] sm:$0x1] }
 0x1e5   : > { %v474_v50 = vshrl.u32 %v473_v48, 7 }
 0x1e7   : > { %v475_v51 = vadd.s32 8, %v474_v50  ;;  %vm478_vm1 = vcmp.lt.s32.totalorder %v474_v50, %v477_v49 }
 0x1e8   : > { %v779_v53 = vsel %vm478_vm1, 1.0, %v1055_v52 }
 0x1e9   : > { %vm479_vm2 = vcmp.lt.s32.totalorder %v475_v51, %v477_v49  ;;  %v484_v54 = vmul.f32 %v779_v53, %v459_v44  ;;  %v486_v55 = vmul.f32 %v779_v53, %v461_v46 }
 0x1ea   : > { %v780_v56 = vsel %vm479_vm2, 1.0, %v1055_v52 }
 0x1eb   : > { %v485_v57 = vmul.f32 %v780_v56, %v460_v45  ;;  %v487_v58 = vmul.f32 %v780_v56, %v462_v47  ;;  %v501_v59 = vmul.f32 %v484_v54, %v459_v44  ;;  %v503_v62 = vmul.f32 %v486_v55, %v461_v46 }
 0x1ed   : > { %v489_v60 = vadd.f32 %v485_v57, %v484_v54  ;;  %v502_v61 = vmul.f32 %v485_v57, %v460_v45  ;;  %v504_v0 = vmul.f32 %v487_v58, %v462_v47 }
 0x1ef   : > { %v490_v63 = vadd.f32 %v489_v60, %v486_v55  ;;  %v505_v1 = vadd.f32 %v502_v61, %v501_v59 }
 0x1f1   : > { %v491_v2 = vadd.f32 %v490_v63, %v487_v58  ;;  %v506_v3 = vadd.f32 %v505_v1, %v503_v62 }
 0x1f3   : > { %v492_v4 = vrot.slane %v491_v2, 4  ;;  %v507_v5 = vadd.f32 %v506_v3, %v504_v0 }
 0x1f5   : > { %v493_v6 = vadd.f32 %v492_v4, %v491_v2  ;;  %v508_v7 = vrot.slane %v507_v5, 4 }
 0x1f7   : > { %v494_v8 = vrot.slane %v493_v6, 2  ;;  %v509_v9 = vadd.f32 %v508_v7, %v507_v5 }
 0x1f9   : > { %v495_v10 = vadd.f32 %v494_v8, %v493_v6  ;;  %v510_v11 = vrot.slane %v509_v9, 2 }
 0x1fb   : > { %v496_v12 = vrot.slane %v495_v10, 1  ;;  %v511_v13 = vadd.f32 %v510_v11, %v509_v9 }
 0x1fd   : > { %v497_v15 = vadd.f32 %v496_v12, %v495_v10  ;;  %v512_v16 = vrot.slane %v511_v13, 1 }
 0x1ff   : > { %v498_v18 = vadd.f32 %v497_v15, %v488_v14  ;;  %v513_v19 = vadd.f32 %v512_v16, %v511_v13 }
 0x201   : > { %499 = vst [vmem:[#allocation3] sm:$0x1] %v498_v18  ;;  %v514_v20 = vadd.f32 %v513_v19, %v500_v17 }
 0x203   : > { %515 = vst [vmem:[#allocation4] sm:$0x1] %v514_v20 }
 0x204 PF: > { %518 = sbr.rel (!%p1263_p12) target bundleno = 539 (0x21b), region = 60  ;;  %v520_v21 = vadd.f32 (%p1263_p12), %v460_v45, %v459_v44  ;;  %v532_v22 = vmul.f32 (%p1263_p12), %v459_v44, %v459_v44  ;;  %v533_v23 = vmul.f32 (%p1263_p12), %v460_v45, %v460_v45  ;;  %v534_v24 = vmul.f32 (%p1263_p12), %v461_v46, %v461_v46 }
 0x205   : > { %v535_v26 = vmul.f32 (%p1263_p12), %v462_v47, %v462_v47 }
 0x206   : > { %v521_v25 = vadd.f32 (%p1263_p12), %v520_v21, %v461_v46  ;;  %v536_v27 = vadd.f32 (%p1263_p12), %v533_v23, %v532_v22 }
 0x208   : > { %v522_v28 = vadd.f32 (%p1263_p12), %v521_v25, %v462_v47  ;;  %v537_v29 = vadd.f32 (%p1263_p12), %v536_v27, %v534_v24  ;;  %v519_v40 = vld [vmem:[#allocation3] sm:$0x1] (%p1263_p12) }
 0x20a   : > { %v523_v30 = vrot.slane %v522_v28, 4  ;;  %v538_v31 = vadd.f32 %v537_v29, %v535_v26  ;;  %v531_v43 = vld [vmem:[#allocation4] sm:$0x1] }
 0x20c   : > { %v524_v32 = vadd.f32 %v523_v30, %v522_v28  ;;  %v539_v33 = vrot.slane %v538_v31, 4 }
 0x20e   : > { %v525_v34 = vrot.slane %v524_v32, 2  ;;  %v540_v35 = vadd.f32 %v539_v33, %v538_v31 }
 0x210   : > { %v526_v36 = vadd.f32 %v525_v34, %v524_v32  ;;  %v541_v37 = vrot.slane %v540_v35, 2 }
 0x212   : > { %v527_v38 = vrot.slane %v526_v36, 1  ;;  %v542_v39 = vadd.f32 %v541_v37, %v540_v35 }
 0x214   : > { %v528_v41 = vadd.f32 %v527_v38, %v526_v36  ;;  %v543_v42 = vrot.slane %v542_v39, 1 }
 0x216   : > { %v529_v44 = vadd.f32 %v528_v41, %v519_v40  ;;  %v544_v45 = vadd.f32 %v543_v42, %v542_v39 }
 0x218   : > { %530 = vst [vmem:[#allocation3] sm:$0x1] %v529_v44  ;;  %v545_v46 = vadd.f32 %v544_v45, %v531_v43 }
 0x21a   : > { %546 = vst [vmem:[#allocation4] sm:$0x1] %v545_v46 }
 0x21b PF: > { %p781_p13 = scmp.ne.s32.totalorder %s1032_s1, 1 }
 0x21c   : > { %s551_s21 = scvt.s32.f32 (!%p781_p13), %s1194_s17 }
 0x21d   : > { %550 = sbr.rel (%p781_p13) target bundleno = 659 (0x293), region = 64 }
 0x21e   : > { %s552_s8 = smul.f32 (!%p781_p13), 2.0, %s551_s21 }
 0x222   : > { %v553_v47 = vstv %s552_s8  ;;  %v569_v58 = vld [vmem:[#allocation3] sm:$0x1]  ;;  %v572_v60 = vld [vmem:[#allocation4] sm:$0x1]  ;;  %v593_v14 = vld [vmem:[#allocation2 + $0x10] sm:$0xff] }
 0x223   : > { %890 = vrcp.f32 %v553_v47  ;;  %v565_v50 = vand.u32 2147483648, %v553_v47  ;;  %vm559_vm3 = vweird.f32 %v553_v47  ;;  %v563_v52 = vand.u32 2147483647, %v553_v47  ;;  %v577_v8 = vld [vmem:[%s1203_s13] sm:$0x1]  ;;  %v595_v17 = vld [vmem:[#allocation2 + $0x18] sm:$0xff] }
 0x224   : > { %v578_v12 = vld [vmem:[%s1203_s13 + $0x1] sm:$0x1]  ;;  %v596_v18 = vld [vmem:[#allocation2 + $0x8] sm:$0xff] }
 0x225   : > { %v566_v54 = vor.u32 1.1754944e-38, %v565_v50  ;;  %vm564_vm6 = vcmp.eq.f32.partialorder %v563_v52, 8.507059e+37  ;;  %v594_v16 = vld [vmem:[#allocation2] sm:$0xff] }
 0x229   : > { %v891_v48 = vpop.eup %890 }
 0x22a   : > { %v555_v49 = vmul.f32 %v891_v48, %v553_v47  ;;  %vm560_vm4 = vweird.f32 %v891_v48 }
 0x22b   : > { %vm561_vm5 = vmor %vm559_vm3, %vm560_vm4 }
 0x22c   : > { %v556_v51 = vsub.f32 1.0, %v555_v49 }
 0x22e   : > { %v557_v53 = vmul.f32 %v891_v48, %v556_v51 }
 0x230   : > { %v558_v55 = vadd.f32 %v891_v48, %v557_v53 }
 0x232   : > { %v562_v56 = vsel %vm561_vm5, %v891_v48, %v558_v55 }
 0x233   : > { %v567_v57 = vsel %vm564_vm6, %v566_v54, %v562_v56 }
 0x234   : > { %802 = vpush %v567_v57 }
 0x265   : > { %s803_s1 = spop %802 }
 0x266   : > { %v570_v59 = vstv %s803_s1 }
 0x267   : > { %v571_v61 = vmul.f32 %v570_v59, %v569_v58  ;;  %v573_v62 = vmul.f32 %v572_v60, %v570_v59 }
 0x269   : > { %v574_v63 = vmul.f32 %v571_v61, %v571_v61 }
 0x26b   : > { %v575_v0 = vsub.f32 %v573_v62, %v574_v63 }
 0x26d   : > { %v576_v1 = vmax.f32 %v575_v0, 0.0 }
 0x26f   : > { %v579_v2 = vadd.f32 1e-05, %v576_v1 }
 0x271   : > { %892 = vrsqrt.f32 %v579_v2  ;;  %vm586_vm8 = vweird.f32 %v579_v2 }
 0x277   : > { %v893_v3 = vpop.eup %892 }
 0x278   : > { %v581_v4 = vmul.f32 %v893_v3, %v579_v2  ;;  %vm587_vm7 = vweird.f32 %v893_v3 }
 0x279   : > { %vm588_vm9 = vmor %vm586_vm8, %vm587_vm7 }
 0x27a   : > { %v582_v5 = vmul.f32 %v893_v3, %v581_v4 }
 0x27c   : > { %v583_v6 = vmul.f32 0.5, %v582_v5 }
 0x27e   : > { %v584_v7 = vsub.f32 1.5, %v583_v6 }
 0x280   : > { %v585_v9 = vmul.f32 %v893_v3, %v584_v7 }
 0x282   : > { %v589_v10 = vsel %vm588_vm9, %v893_v3, %v585_v9 }
 0x283   : > { %v590_v11 = vmul.f32 %v589_v10, %v577_v8 }
 0x285   : > { %v591_v13 = vmul.f32 %v590_v11, %v571_v61  ;;  %v597_v15 = vperm.slane %v590_v11, 0 }
 0x287   : > { %v592_v19 = vsub.f32 %v578_v12, %v591_v13  ;;  %v598_v20 = vmul.f32 %v597_v15, %v593_v14  ;;  %v599_v21 = vmul.f32 %v597_v15, %v594_v16  ;;  %v600_v22 = vmul.f32 %v597_v15, %v595_v17 }
 0x288   : > { %v601_v23 = vmul.f32 %v597_v15, %v596_v18 }
 0x289   : > { %v602_v24 = vperm.slane %v592_v19, 0 }
 0x28b   : > { %v603_v25 = vadd.f32 %v602_v24, %v598_v20  ;;  %v604_v26 = vadd.f32 %v602_v24, %v599_v21  ;;  %v605_v27 = vadd.f32 %v602_v24, %v600_v22  ;;  %v606_v28 = vadd.f32 %v602_v24, %v601_v23 }
 0x28d   : > { %v607_v29 = vmax.f32 %v603_v25, 0.0  ;;  %v608_v30 = vmax.f32 %v604_v26, 0.0  ;;  %v609_v31 = vmax.f32 %v605_v27, 0.0  ;;  %v610_v32 = vmax.f32 %v606_v28, 0.0 }
 0x28f   : > { %611 = vst [vmem:[%s1222_s3] sm:$0xff] %v607_v29 }
 0x290   : > { %612 = vst [vmem:[%s1222_s3 + $0x8] sm:$0xff] %v608_v30 }
 0x291   : > { %613 = vst [vmem:[%s1222_s3 + $0x10] sm:$0xff] %v609_v31 }
 0x292   : > { %614 = vst [vmem:[%s1222_s3 + $0x18] sm:$0xff] %v610_v32 }
 0x293 PF: > { %s789_s17 = sshll.u32 %s1036_s28, 5  ;;  %s631_s12 = sshll.u32 %s1222_s3, 4  ;;  %s632_s12 = int_to_ptr.vmem [resolvable:$true] %s631_s12 }
 0x294   : > { %s630_s15 = scalar_lea.hbm %s1328_s5, %s789_s17  ;;  %s616_s22 = scalar_lea.sflag [#allocation10], %s1181_s11 }
 0x295   : > { %s633_s19 = sshll.u32 %s630_s15, 4  ;;  %s968_s28 = scalar_lea.hbm %s1328_s5, 128  ;;  %s634_s19 = int_to_ptr.hbm [resolvable:$true] %s633_s19 }
 0x296   : > { %s962_s9 = sshra.s32 %s634_s19, 4  ;;  %s963_s9 = int_to_ptr.hbm [resolvable:$true] %s962_s9 }
 0x297   : > { %s964_s23 = scalar_lea.hbm %s963_s9, 32  ;;  %p969_p4 = scmp.lt.s32.totalorder %s963_s9, %s1328_s5 }
 0x298   : > { %p965_p0 = scmp.ne.s32.totalorder %s963_s9, %s964_s23  ;;  %p970_p3 = scmp.lt.s32.totalorder %s968_s28, %s964_s23 }
 0x29a   : > { %p966_p1 = pnand %p965_p0, %p1157_p10  ;;  %p971_p5 = por %p970_p3, %p969_p4 }
 0x29c   : > { %p967_p2 = pneg %p966_p1 }
 0x29e   : > { %p972_p6 = pnand %p971_p5, %p967_p2 }
 0x2a0   : > { %975 = shalt.err (!%p972_p6)
}
 0x2a1   : > { %s1056_s11 = smov 128   ;;  %s1057_s3 = smov 8  }
 0x2a2   : > { %806 = dma.vmem_to_hbm [thread:$0]  (%p1157_p10), %s632_s12, 512, %s634_s19, %s616_s22, %s1056_s11, %s1056_s11, %s1057_s3  }
 0x2a3 PF: > { %p817_p7 = scmp.ge.s32.totalorder %s1048_s6, 2  ;;  %s648_s21 = sand.u32 1, %s1020_s26  }
 0x2a4   : > { %s649_s8 = scalar_lea.sflag [#allocation10], %s648_s21 }
 0x2a5   : > { %p813_p8 = pnand %p817_p7, %p1163_p11 }
 0x2a7   : > { %p814_p9 = pneg %p813_p8 }
 0x2a9   : > { %1015 = dma.done.wait (%p814_p9), %s649_s8, 512  }
 0x2aa   : > { %1017 = vsyncadd (%p814_p9), %s649_s8, 4294966784  ;;  %s34_s6 = sadd.s32 1, %s1048_s6   ;;  %s1340_s14 = sld [smem:[#allocation15_spill]] }
 0x2ab   : > { %p31_p12 = scmp.ge.s32.totalorder %s34_s6, 10   ;;  %s1341_s17 = sld [smem:[#allocation16_spill]] }
 0x2ac   : > { %s1342_s26 = smov %s1024_s0  ;;  %s1343_s0 = smov %s1028_s27 }
 0x2ad   : > { %s1344_s27 = smov %s1170_s18  ;;  %s1345_s1 = smov %s1040_s29 }
 0x2ae   : > { %s1346_s28 = smov %s1044_s30  ;;  %33 = sbr.rel (!%p31_p12) target bundleno = 15 (0xf), region = 113 }
 0x2b0   : > { %s1347_s29 = smov %s1340_s14 }
 0x2b1   : > { %s1348_s30 = smov %s1341_s17 }
 0x2b3   :  { %655 = vsyncpa [#allocation9], 1 }
 0x2b4   :  { %657 = vsyncpa [#allocation9 + $0x1], 1 }
 0x2b5   :  { %658 = vsyncpa [#allocation10], 1 }
 0x2b6   :  { %660 = vsyncpa [#allocation10 + $0x1], 1 }

</bundles_post_ra>
